<compile_context>
chip_gen: v7x
topology: tpu7x:2x2x1
jax: 0.10.0
libtpu: 0.0.40
codegen_flags: <defaults>
</compile_context>

<pallas_src>
import jax
import jax.numpy as jnp
from jax.experimental import pallas as pl
from jax.experimental.pallas import tpu as pltpu


# ----------------------------------------------------------------------------
# Kernel 1: one GCN layer, h = relu((A @ Y) @ W + b), tiled over rows of A and
# over the contraction (node) axis.
# ----------------------------------------------------------------------------
def gcn_layer_kernel(a_ref, y_ref, w_ref, b_ref, h_ref, acc_ref):
    k = pl.program_id(1)

    @pl.when(k == 0)
    def _():
        acc_ref[...] = jnp.zeros_like(acc_ref)

    # The N^2-sized contraction: bf16 operands on the MXU, f32 accumulation.
    acc_ref[...] += jnp.dot(a_ref[...], y_ref[...],
                            preferred_element_type=jnp.float32)

    @pl.when(k == pl.num_programs(1) - 1)
    def _():
        # Small (tm, F) x (F, E) matmul + bias + ReLU epilogue, f32 accumulate.
        h = jnp.dot(acc_ref[...].astype(jnp.bfloat16), w_ref[...],
                    preferred_element_type=jnp.float32) + b_ref[...]
        h_ref[...] = jnp.maximum(h, 0.0).astype(h_ref.dtype)


def gcn_layer(a_bf16, y_bf16, w_bf16, b_f32, *, out_dtype):
    """relu((A @ Y) @ W + b) with row/contraction tiling.  A, Y, W are bf16."""
    n = a_bf16.shape[0]
    fy = y_bf16.shape[1]
    e = w_bf16.shape[1]

    tm = n if n <= 256 else 256          # row tile (sublane axis, %8 at scale)
    tk = n if n <= 512 else 512          # contraction tile (lane axis, %128 at scale)
    assert n % tm == 0 and n % tk == 0, "pad N to a multiple of the tile sizes"
    grid = (n // tm, n // tk)

    est = (2 * tm * tk * 2 + 2 * tk * fy * 2 + fy * e * 2 + e * 4
           + 2 * tm * e * 4 + tm * fy * 4)
    params = pltpu.CompilerParams(
        dimension_semantics=("parallel", "arbitrary"),
        vmem_limit_bytes=int(min(max(4 * est, 8 << 20), 48 << 20)))
    cost = pl.CostEstimate(
        flops=2 * n * n * fy + 2 * n * fy * e,
        transcendentals=0,
        bytes_accessed=n * n * 2 + n * fy * 2 + fy * e * 2 + e * 4
                       + n * e * jnp.dtype(out_dtype).itemsize)

    return pl.pallas_call(
        gcn_layer_kernel,
        out_shape=jax.ShapeDtypeStruct((n, e), out_dtype),
        grid_spec=pltpu.PrefetchScalarGridSpec(
            num_scalar_prefetch=0,
            grid=grid,
            in_specs=[
                pl.BlockSpec((tm, tk), lambda i, k: (i, k)),   # A_norm tile (bf16)
                pl.BlockSpec((tk, fy), lambda i, k: (k, 0)),   # feature tile (bf16)
                pl.BlockSpec((fy, e), lambda i, k: (0, 0)),    # W (bf16, grid-invariant)
                pl.BlockSpec((1, e), lambda i, k: (0, 0)),     # bias (f32)
            ],
            out_specs=pl.BlockSpec((tm, e), lambda i, k: (i, 0)),
            scratch_shapes=[pltpu.VMEM((tm, fy), jnp.float32)],
        ),
        compiler_params=params,
        cost_estimate=cost,
    )(a_bf16, y_bf16, w_bf16, b_f32.reshape(1, e))


# ----------------------------------------------------------------------------
# Kernel 2: global max + mean pooling over graphs, accumulated over node tiles.
# ----------------------------------------------------------------------------
def pool_kernel(maskT_ref, h_ref, gmax_ref, gmean_ref, max_acc, sum_acc, cnt_acc):
    k = pl.program_id(0)
    num_graphs = max_acc.shape[0]

    @pl.when(k == 0)
    def _():
        # 0.0 is a valid max identity because h >= 0 after ReLU.
        max_acc[...] = jnp.zeros_like(max_acc)
        sum_acc[...] = jnp.zeros_like(sum_acc)
        cnt_acc[...] = jnp.zeros_like(cnt_acc)

    maskT = maskT_ref[...]                     # (tn, G) one-hot node -> graph, f32
    h = h_ref[...]                             # (tn, E) f32, post-ReLU

    # Static unroll over graphs: working set stays at (tn, E); never builds a
    # (G, tn, E) intermediate.
    # TODO(synk): switch to lax.fori_loop with dynamic ref indexing for large G.
    for g in range(num_graphs):
        col = maskT[:, g:g + 1]                # (tn, 1)
        masked = col * h                       # (tn, E)   VPU
        max_acc[g:g + 1, :] = jnp.maximum(
            max_acc[g:g + 1, :], jnp.max(masked, axis=0, keepdims=True))
        sum_acc[g:g + 1, :] += jnp.sum(masked, axis=0, keepdims=True)
        cnt_acc[g:g + 1, :] += jnp.sum(col, axis=0, keepdims=True)

    @pl.when(k == pl.num_programs(0) - 1)
    def _():
        gmax_ref[...] = max_acc[...]
        inv_cnt = pl.reciprocal(jnp.maximum(cnt_acc[...], 1.0), approx=True)  # EUP
        gmean_ref[...] = sum_acc[...] * inv_cnt


def global_max_mean_pool(maskT_f32, h_f32):
    n, g = maskT_f32.shape
    e = h_f32.shape[1]
    tn = n if n <= 512 else 512
    assert n % tn == 0
    grid = (n // tn,)

    est = 2 * tn * g * 4 + 2 * tn * e * 4 + 2 * g * e * 4 + 3 * g * e * 4
    params = pltpu.CompilerParams(
        dimension_semantics=("arbitrary",),
        vmem_limit_bytes=int(min(max(4 * est, 8 << 20), 48 << 20)))
    cost = pl.CostEstimate(
        flops=4 * g * n * e + g * n,
        transcendentals=g,
        bytes_accessed=n * g * 4 + n * e * 4 + 2 * g * e * 4)

    return pl.pallas_call(
        pool_kernel,
        out_shape=(jax.ShapeDtypeStruct((g, e), jnp.float32),   # max pool
                   jax.ShapeDtypeStruct((g, e), jnp.float32)),  # mean pool
        grid_spec=pltpu.PrefetchScalarGridSpec(
            num_scalar_prefetch=0,
            grid=grid,
            in_specs=[
                pl.BlockSpec((tn, g), lambda k: (k, 0)),        # mask^T tile
                pl.BlockSpec((tn, e), lambda k: (k, 0)),        # h2 tile
            ],
            out_specs=(pl.BlockSpec((g, e), lambda k: (0, 0)),
                       pl.BlockSpec((g, e), lambda k: (0, 0))),
            scratch_shapes=[pltpu.VMEM((g, e), jnp.float32),
                            pltpu.VMEM((g, e), jnp.float32),
                            pltpu.VMEM((g, 1), jnp.float32)],
        ),
        compiler_params=params,
        cost_estimate=cost,
    )(maskT_f32, h_f32)


# ----------------------------------------------------------------------------
# Full forward pass.
# ----------------------------------------------------------------------------
def gcn_forward(a_norm, x, w1, b1, w2, b2, maskT, w_out, b_out):
    a_bf = a_norm.astype(jnp.bfloat16)
    # Layer 1: (A @ x) @ W1 (re-associated; F <= E).  h1 only feeds the next
    # A-contraction, so keep it bf16 (halves its HBM traffic).
    h1 = gcn_layer(a_bf, x.astype(jnp.bfloat16), w1.astype(jnp.bfloat16), b1,
                   out_dtype=jnp.bfloat16)
    # Layer 2: (A @ h1) @ W2.  Output stays f32 for the pooling elementwise math.
    h2 = gcn_layer(a_bf, h1, w2.astype(jnp.bfloat16), b2, out_dtype=jnp.float32)
    g_max, g_mean = global_max_mean_pool(maskT, h2)
    # Final (2E -> 1) Linear kept in XLA so the kernel outputs stay lane-dense.
    return jnp.concatenate([g_max, g_mean], axis=1) @ w_out + b_out


# ----------------------------------------------------------------------------
# Glue: dense normalized adjacency + pooling mask + init helpers.
# ----------------------------------------------------------------------------
def build_normalized_adjacency(edge_index, num_nodes):
    """Dense D^{-1/2} (A + I) D^{-1/2} as used by PyG GCNConv."""
    src, dst = edge_index[0], edge_index[1]
    adj = jnp.zeros((num_nodes, num_nodes), jnp.float32)
    adj = adj.at[dst, src].set(1.0)                       # message flows src -> dst
    adj = adj + jnp.eye(num_nodes, dtype=jnp.float32)     # self loops
    deg = jnp.sum(adj, axis=1)
    dinv = jnp.where(deg > 0, 1.0 / jnp.sqrt(deg), 0.0)
    return dinv[:, None] * adj * dinv[None, :]


def xavier_normal(key, shape):
    fan_in, fan_out = shape[0], shape[1]
    std = jnp.sqrt(2.0 / (fan_in + fan_out))
    return std * jax.random.normal(key, shape, jnp.float32)


# ----------------------------------------------------------------------------
# References for the correctness check.
# ----------------------------------------------------------------------------
def reference_mirror(a, x, w1, b1, w2, b2, mask, w_out, b_out):
    """Pure-JAX reference mirroring the kernel's precision recipe (bf16 MXU, f32 acc)."""
    a_bf = a.astype(jnp.bfloat16)
    ax = jnp.dot(a_bf, x.astype(jnp.bfloat16), preferred_element_type=jnp.float32)
    h1 = jnp.maximum(jnp.dot(ax.astype(jnp.bfloat16), w1.astype(jnp.bfloat16),
                             preferred_element_type=jnp.float32) + b1, 0.0)
    h1 = h1.astype(jnp.bfloat16)
    ah = jnp.dot(a_bf, h1, preferred_element_type=jnp.float32)
    h2 = jnp.maximum(jnp.dot(ah.astype(jnp.bfloat16), w2.astype(jnp.bfloat16),
                             preferred_element_type=jnp.float32) + b2, 0.0)
    masked = jnp.where(mask[:, :, None] > 0, h2[None], 0.0)
    g_max = jnp.max(masked, axis=1)
    cnt = jnp.maximum(jnp.sum(mask, axis=1, keepdims=True), 1.0)
    g_mean = jnp.sum(masked, axis=1) / cnt
    return jnp.concatenate([g_max, g_mean], axis=1) @ w_out + b_out


def reference_f32(a, x, w1, b1, w2, b2, mask, w_out, b_out):
    """Full-f32 PyTorch-form reference (A @ (x @ W)) for a loose semantic sanity check."""
    hi = jax.lax.Precision.HIGHEST
    h1 = jnp.maximum(jnp.dot(a, jnp.dot(x, w1, precision=hi), precision=hi) + b1, 0.0)
    h2 = jnp.maximum(jnp.dot(a, jnp.dot(h1, w2, precision=hi), precision=hi) + b2, 0.0)
    g_max = jnp.max(jnp.where(mask[:, :, None] > 0, h2[None], -jnp.inf), axis=1)
    cnt = jnp.maximum(jnp.sum(mask, axis=1, keepdims=True), 1.0)
    g_mean = jnp.dot(mask, h2, precision=hi) / cnt
    return jnp.concatenate([g_max, g_mean], axis=1) @ w_out + b_out


if __name__ == "__main__":
    # N nodes, F input features, E embedding size, G graphs in the batch.
    N, F, E, G = 32, 8, 16, 2
    num_edges = 64

    key = jax.random.PRNGKey(0)
    k_x, k_e1, k_e2, k_w1, k_w2, k_wo = jax.random.split(key, 6)

    x = jax.random.normal(k_x, (N, F), jnp.float32)
    edge_src = jax.random.randint(k_e1, (num_edges,), 0, N)
    edge_dst = jax.random.randint(k_e2, (num_edges,), 0, N)
    edge_index = jnp.stack([edge_src, edge_dst], axis=0)
    batch_index = jnp.concatenate(
        [jnp.zeros((N // 2,), jnp.int32), jnp.ones((N - N // 2,), jnp.int32)])

    # init.normal_ for GCN lin weights, zeros bias, xavier_normal_ for out Linear.
    w1 = jax.random.normal(k_w1, (F, E), jnp.float32)    # lin.weight^T
    b1 = jnp.zeros((E,), jnp.float32)
    w2 = jax.random.normal(k_w2, (E, E), jnp.float32)
    b2 = jnp.zeros((E,), jnp.float32)
    w_out = xavier_normal(k_wo, (2 * E, 1))              # out.weight^T
    b_out = jnp.zeros((1,), jnp.float32)

    a_norm = build_normalized_adjacency(edge_index, N)
    mask = (batch_index[None, :] == jnp.arange(G)[:, None]).astype(jnp.float32)  # (G, N)
    maskT = mask.T                                                                # (N, G)

    fwd = jax.jit(gcn_forward)
    out = jax.block_until_ready(fwd(a_norm, x, w1, b1, w2, b2, maskT, w_out, b_out))
    assert out.shape == (G, 1)

    # Strong check: same bf16/f32 precision recipe as the kernels.
    ref = reference_mirror(a_norm, x, w1, b1, w2, b2, mask, w_out, b_out)
    assert jnp.allclose(out, ref, atol=5e-2, rtol=1e-2), (out, ref)

    # Loose sanity check against the full-f32 PyTorch-form math (bf16 quantization noise).
    ref32 = reference_f32(a_norm, x, w1, b1, w2, b2, mask, w_out, b_out)
    err = float(jnp.max(jnp.abs(out - ref32)))
    scale = float(jnp.max(jnp.abs(ref32)))
    assert err <= 0.15 * max(1.0, scale), (err, scale, out, ref32)

    print("KERNEL_OK")
</pallas_src>

<mosaic_0001>
module attributes {stable_mosaic.version = 11 : i64} {
  func.func @gcn_layer_kernel(%arg0: i32, %arg1: i32, %arg2: memref<32x32xbf16, #tpu.memory_space<vmem>>, %arg3: memref<32x8xbf16, #tpu.memory_space<vmem>>, %arg4: memref<8x16xbf16, #tpu.memory_space<vmem>>, %arg5: memref<1x16xf32, #tpu.memory_space<vmem>>, %arg6: memref<32x16xbf16, #tpu.memory_space<vmem>>, %arg7: memref<32x8xf32, #tpu.memory_space<vmem>>) attributes {dimension_semantics = [#tpu.dimension_semantics<parallel>, #tpu.dimension_semantics<arbitrary>], iteration_bounds = array<i64: 1, 1>, scalar_prefetch = 0 : i64, scratch_operands = 1 : i64, tpu.core_type = #tpu.core_type<tc>, window_params = [{transform_indices = @transform_0, window_bounds = array<i64: 32, 32>}, {transform_indices = @transform_1, window_bounds = array<i64: 32, 8>}, {pipeline_mode = #tpu.pipeline_mode<synchronous>, transform_indices = @transform_2, window_bounds = array<i64: 8, 16>}, {pipeline_mode = #tpu.pipeline_mode<synchronous>, transform_indices = @transform_3, window_bounds = array<i64: 1, 16>}, {transform_indices = @transform_4, window_bounds = array<i64: 32, 16>}]} {
    %c0_i32 = arith.constant 0 : i32
    %0 = arith.cmpi eq, %arg1, %c0_i32 : i32
    %1 = arith.extui %0 : i1 to i32
    %c0_i32_0 = arith.constant 0 : i32
    %2 = arith.cmpi ne, %1, %c0_i32_0 : i32
    scf.if %2 {
      %cst_10 = arith.constant 0.000000e+00 : f32
      %12 = vector.broadcast %cst_10 : f32 to vector<32x8xf32>
      %c0_11 = arith.constant 0 : index
      %c0_12 = arith.constant 0 : index
      %13 = vector.load %arg7[%c0_11, %c0_12] : memref<32x8xf32, #tpu.memory_space<vmem>>, vector<32x8xf32>
      tpu.vector_store %arg7[%c0_11, %c0_12], %12 {strides = array<i32>} : memref<32x8xf32, #tpu.memory_space<vmem>>, vector<32x8xf32>,
    } else {
    }
    %c0 = arith.constant 0 : index
    %c0_1 = arith.constant 0 : index
    %3 = vector.load %arg7[%c0, %c0_1] : memref<32x8xf32, #tpu.memory_space<vmem>>, vector<32x8xf32>
    %c0_2 = arith.constant 0 : index
    %c0_3 = arith.constant 0 : index
    %4 = vector.load %arg2[%c0_2, %c0_3] : memref<32x32xbf16, #tpu.memory_space<vmem>>, vector<32x32xbf16>
    %c0_4 = arith.constant 0 : index
    %c0_5 = arith.constant 0 : index
    %5 = vector.load %arg3[%c0_4, %c0_5] : memref<32x8xbf16, #tpu.memory_space<vmem>>, vector<32x8xbf16>
    %cst = arith.constant dense<0.000000e+00> : vector<32x8xf32>
    %6 = tpu.matmul %4, %5, %cst {dimension_numbers = #tpu.dot_dimension_numbers<[1], [0], [0], [1], [0, 0, 1, 1], [], []>} : vector<32x32xbf16>, vector<32x8xbf16>, vector<32x8xf32> -> vector<32x8xf32>
    %7 = arith.addf %3, %6 : vector<32x8xf32>
    %c0_6 = arith.constant 0 : index
    %c0_7 = arith.constant 0 : index
    %8 = vector.load %arg7[%c0_6, %c0_7] : memref<32x8xf32, #tpu.memory_space<vmem>>, vector<32x8xf32>
    tpu.vector_store %arg7[%c0_6, %c0_7], %7 {strides = array<i32>} : memref<32x8xf32, #tpu.memory_space<vmem>>, vector<32x8xf32>,
    %c0_i32_8 = arith.constant 0 : i32
    %9 = arith.cmpi eq, %arg1, %c0_i32_8 : i32
    %10 = arith.extui %9 : i1 to i32
    %c0_i32_9 = arith.constant 0 : i32
    %11 = arith.cmpi ne, %10, %c0_i32_9 : i32
    scf.if %11 {
      %c0_10 = arith.constant 0 : index
      %c0_11 = arith.constant 0 : index
      %12 = vector.load %arg7[%c0_10, %c0_11] : memref<32x8xf32, #tpu.memory_space<vmem>>, vector<32x8xf32>
      %13 = arith.truncf %12 : vector<32x8xf32> to vector<32x8xbf16>
      %c0_12 = arith.constant 0 : index
      %c0_13 = arith.constant 0 : index
      %14 = vector.load %arg4[%c0_12, %c0_13] : memref<8x16xbf16, #tpu.memory_space<vmem>>, vector<8x16xbf16>
      %cst_14 = arith.constant dense<0.000000e+00> : vector<32x16xf32>
      %15 = tpu.matmul %13, %14, %cst_14 {dimension_numbers = #tpu.dot_dimension_numbers<[1], [0], [0], [1], [0, 0, 1, 1], [], []>} : vector<32x8xbf16>, vector<8x16xbf16>, vector<32x16xf32> -> vector<32x16xf32>
      %c0_15 = arith.constant 0 : index
      %c0_16 = arith.constant 0 : index
      %16 = vector.load %arg5[%c0_15, %c0_16] : memref<1x16xf32, #tpu.memory_space<vmem>>, vector<1x16xf32>
      %17 = vector.broadcast %16 : vector<1x16xf32> to vector<32x16xf32>
      %18 = arith.addf %15, %17 : vector<32x16xf32>
      %cst_17 = arith.constant 0.000000e+00 : f32
      %19 = vector.broadcast %cst_17 : f32 to vector<32x16xf32>
      %20 = arith.maximumf %18, %19 : vector<32x16xf32>
      %21 = arith.truncf %20 : vector<32x16xf32> to vector<32x16xbf16>
      %c0_18 = arith.constant 0 : index
      %c0_19 = arith.constant 0 : index
      %22 = vector.load %arg6[%c0_18, %c0_19] : memref<32x16xbf16, #tpu.memory_space<vmem>>, vector<32x16xbf16>
      tpu.vector_store %arg6[%c0_18, %c0_19], %21 {strides = array<i32>} : memref<32x16xbf16, #tpu.memory_space<vmem>>, vector<32x16xbf16>,
    } else {
    }
    return
  }
  func.func @transform_0(%arg0: i32, %arg1: i32) -> (i32, i32) {
    %c0_i32 = arith.constant 0 : i32
    return %arg0, %arg1 : i32, i32
  }
  func.func @transform_1(%arg0: i32, %arg1: i32) -> (i32, i32) {
    %c0_i32 = arith.constant 0 : i32
    %c0_i32_0 = arith.constant 0 : i32
    return %arg1, %c0_i32 : i32, i32
  }
  func.func @transform_2(%arg0: i32, %arg1: i32) -> (i32, i32) {
    %c0_i32 = arith.constant 0 : i32
    %c0_i32_0 = arith.constant 0 : i32
    %c0_i32_1 = arith.constant 0 : i32
    return %c0_i32, %c0_i32_0 : i32, i32
  }
  func.func @transform_3(%arg0: i32, %arg1: i32) -> (i32, i32) {
    %c0_i32 = arith.constant 0 : i32
    %c0_i32_0 = arith.constant 0 : i32
    %c0_i32_1 = arith.constant 0 : i32
    return %c0_i32, %c0_i32_0 : i32, i32
  }
  func.func @transform_4(%arg0: i32, %arg1: i32) -> (i32, i32) {
    %c0_i32 = arith.constant 0 : i32
    %c0_i32_0 = arith.constant 0 : i32
    return %arg0, %c0_i32 : i32, i32
  }
}

module attributes {stable_mosaic.version = 11 : i64} {
  func.func @gcn_layer_kernel(%arg0: i32, %arg1: i32, %arg2: memref<32x32xbf16, #tpu.memory_space<vmem>>, %arg3: memref<32x16xbf16, #tpu.memory_space<vmem>>, %arg4: memref<16x16xbf16, #tpu.memory_space<vmem>>, %arg5: memref<1x16xf32, #tpu.memory_space<vmem>>, %arg6: memref<32x16xf32, #tpu.memory_space<vmem>>, %arg7: memref<32x16xf32, #tpu.memory_space<vmem>>) attributes {dimension_semantics = [#tpu.dimension_semantics<parallel>, #tpu.dimension_semantics<arbitrary>], iteration_bounds = array<i64: 1, 1>, scalar_prefetch = 0 : i64, scratch_operands = 1 : i64, tpu.core_type = #tpu.core_type<tc>, window_params = [{transform_indices = @transform_0, window_bounds = array<i64: 32, 32>}, {transform_indices = @transform_1, window_bounds = array<i64: 32, 16>}, {pipeline_mode = #tpu.pipeline_mode<synchronous>, transform_indices = @transform_2, window_bounds = array<i64: 16, 16>}, {pipeline_mode = #tpu.pipeline_mode<synchronous>, transform_indices = @transform_3, window_bounds = array<i64: 1, 16>}, {transform_indices = @transform_4, window_bounds = array<i64: 32, 16>}]} {
    %c0_i32 = arith.constant 0 : i32
    %0 = arith.cmpi eq, %arg1, %c0_i32 : i32
    %1 = arith.extui %0 : i1 to i32
    %c0_i32_0 = arith.constant 0 : i32
    %2 = arith.cmpi ne, %1, %c0_i32_0 : i32
    scf.if %2 {
      %cst_10 = arith.constant 0.000000e+00 : f32
      %12 = vector.broadcast %cst_10 : f32 to vector<32x16xf32>
      %c0_11 = arith.constant 0 : index
      %c0_12 = arith.constant 0 : index
      %13 = vector.load %arg7[%c0_11, %c0_12] : memref<32x16xf32, #tpu.memory_space<vmem>>, vector<32x16xf32>
      tpu.vector_store %arg7[%c0_11, %c0_12], %12 {strides = array<i32>} : memref<32x16xf32, #tpu.memory_space<vmem>>, vector<32x16xf32>,
    } else {
    }
    %c0 = arith.constant 0 : index
    %c0_1 = arith.constant 0 : index
    %3 = vector.load %arg7[%c0, %c0_1] : memref<32x16xf32, #tpu.memory_space<vmem>>, vector<32x16xf32>
    %c0_2 = arith.constant 0 : index
    %c0_3 = arith.constant 0 : index
    %4 = vector.load %arg2[%c0_2, %c0_3] : memref<32x32xbf16, #tpu.memory_space<vmem>>, vector<32x32xbf16>
    %c0_4 = arith.constant 0 : index
    %c0_5 = arith.constant 0 : index
    %5 = vector.load %arg3[%c0_4, %c0_5] : memref<32x16xbf16, #tpu.memory_space<vmem>>, vector<32x16xbf16>
    %cst = arith.constant dense<0.000000e+00> : vector<32x16xf32>
    %6 = tpu.matmul %4, %5, %cst {dimension_numbers = #tpu.dot_dimension_numbers<[1], [0], [0], [1], [0, 0, 1, 1], [], []>} : vector<32x32xbf16>, vector<32x16xbf16>, vector<32x16xf32> -> vector<32x16xf32>
    %7 = arith.addf %3, %6 : vector<32x16xf32>
    %c0_6 = arith.constant 0 : index
    %c0_7 = arith.constant 0 : index
    %8 = vector.load %arg7[%c0_6, %c0_7] : memref<32x16xf32, #tpu.memory_space<vmem>>, vector<32x16xf32>
    tpu.vector_store %arg7[%c0_6, %c0_7], %7 {strides = array<i32>} : memref<32x16xf32, #tpu.memory_space<vmem>>, vector<32x16xf32>,
    %c0_i32_8 = arith.constant 0 : i32
    %9 = arith.cmpi eq, %arg1, %c0_i32_8 : i32
    %10 = arith.extui %9 : i1 to i32
    %c0_i32_9 = arith.constant 0 : i32
    %11 = arith.cmpi ne, %10, %c0_i32_9 : i32
    scf.if %11 {
      %c0_10 = arith.constant 0 : index
      %c0_11 = arith.constant 0 : index
      %12 = vector.load %arg7[%c0_10, %c0_11] : memref<32x16xf32, #tpu.memory_space<vmem>>, vector<32x16xf32>
      %13 = arith.truncf %12 : vector<32x16xf32> to vector<32x16xbf16>
      %c0_12 = arith.constant 0 : index
      %c0_13 = arith.constant 0 : index
      %14 = vector.load %arg4[%c0_12, %c0_13] : memref<16x16xbf16, #tpu.memory_space<vmem>>, vector<16x16xbf16>
      %cst_14 = arith.constant dense<0.000000e+00> : vector<32x16xf32>
      %15 = tpu.matmul %13, %14, %cst_14 {dimension_numbers = #tpu.dot_dimension_numbers<[1], [0], [0], [1], [0, 0, 1, 1], [], []>} : vector<32x16xbf16>, vector<16x16xbf16>, vector<32x16xf32> -> vector<32x16xf32>
      %c0_15 = arith.constant 0 : index
      %c0_16 = arith.constant 0 : index
      %16 = vector.load %arg5[%c0_15, %c0_16] : memref<1x16xf32, #tpu.memory_space<vmem>>, vector<1x16xf32>
      %17 = vector.broadcast %16 : vector<1x16xf32> to vector<32x16xf32>
      %18 = arith.addf %15, %17 : vector<32x16xf32>
      %cst_17 = arith.constant 0.000000e+00 : f32
      %19 = vector.broadcast %cst_17 : f32 to vector<32x16xf32>
      %20 = arith.maximumf %18, %19 : vector<32x16xf32>
      %c0_18 = arith.constant 0 : index
      %c0_19 = arith.constant 0 : index
      %21 = vector.load %arg6[%c0_18, %c0_19] : memref<32x16xf32, #tpu.memory_space<vmem>>, vector<32x16xf32>
      tpu.vector_store %arg6[%c0_18, %c0_19], %20 {strides = array<i32>} : memref<32x16xf32, #tpu.memory_space<vmem>>, vector<32x16xf32>,
    } else {
    }
    return
  }
  func.func @transform_0(%arg0: i32, %arg1: i32) -> (i32, i32) {
    %c0_i32 = arith.constant 0 : i32
    return %arg0, %arg1 : i32, i32
  }
  func.func @transform_1(%arg0: i32, %arg1: i32) -> (i32, i32) {
    %c0_i32 = arith.constant 0 : i32
    %c0_i32_0 = arith.constant 0 : i32
    return %arg1, %c0_i32 : i32, i32
  }
  func.func @transform_2(%arg0: i32, %arg1: i32) -> (i32, i32) {
    %c0_i32 = arith.constant 0 : i32
    %c0_i32_0 = arith.constant 0 : i32
    %c0_i32_1 = arith.constant 0 : i32
    return %c0_i32, %c0_i32_0 : i32, i32
  }
  func.func @transform_3(%arg0: i32, %arg1: i32) -> (i32, i32) {
    %c0_i32 = arith.constant 0 : i32
    %c0_i32_0 = arith.constant 0 : i32
    %c0_i32_1 = arith.constant 0 : i32
    return %c0_i32, %c0_i32_0 : i32, i32
  }
  func.func @transform_4(%arg0: i32, %arg1: i32) -> (i32, i32) {
    %c0_i32 = arith.constant 0 : i32
    %c0_i32_0 = arith.constant 0 : i32
    return %arg0, %c0_i32 : i32, i32
  }
}

module attributes {stable_mosaic.version = 11 : i64} {
  func.func @pool_kernel(%arg0: i32, %arg1: memref<32x2xf32, #tpu.memory_space<vmem>>, %arg2: memref<32x16xf32, #tpu.memory_space<vmem>>, %arg3: memref<2x16xf32, #tpu.memory_space<vmem>>, %arg4: memref<2x16xf32, #tpu.memory_space<vmem>>, %arg5: memref<2x16xf32, #tpu.memory_space<vmem>>, %arg6: memref<2x16xf32, #tpu.memory_space<vmem>>, %arg7: memref<2x1xf32, #tpu.memory_space<vmem>>) attributes {dimension_semantics = [#tpu.dimension_semantics<arbitrary>], iteration_bounds = array<i64: 1>, scalar_prefetch = 0 : i64, scratch_operands = 3 : i64, tpu.core_type = #tpu.core_type<tc>, window_params = [{transform_indices = @transform_0, window_bounds = array<i64: 32, 2>}, {transform_indices = @transform_1, window_bounds = array<i64: 32, 16>}, {pipeline_mode = #tpu.pipeline_mode<synchronous>, transform_indices = @transform_2, window_bounds = array<i64: 2, 16>}, {pipeline_mode = #tpu.pipeline_mode<synchronous>, transform_indices = @transform_3, window_bounds = array<i64: 2, 16>}]} {
    %c0_i32 = arith.constant 0 : i32
    %0 = arith.cmpi eq, %arg0, %c0_i32 : i32
    %1 = arith.extui %0 : i1 to i32
    %c0_i32_0 = arith.constant 0 : i32
    %2 = arith.cmpi ne, %1, %c0_i32_0 : i32
    scf.if %2 {
      %cst_34 = arith.constant 0.000000e+00 : f32
      %44 = vector.broadcast %cst_34 : f32 to vector<2x16xf32>
      %c0_35 = arith.constant 0 : index
      %c0_36 = arith.constant 0 : index
      %45 = vector.load %arg5[%c0_35, %c0_36] : memref<2x16xf32, #tpu.memory_space<vmem>>, vector<2x16xf32>
      tpu.vector_store %arg5[%c0_35, %c0_36], %44 {strides = array<i32>} : memref<2x16xf32, #tpu.memory_space<vmem>>, vector<2x16xf32>,
      %cst_37 = arith.constant 0.000000e+00 : f32
      %46 = vector.broadcast %cst_37 : f32 to vector<2x16xf32>
      %c0_38 = arith.constant 0 : index
      %c0_39 = arith.constant 0 : index
      %47 = vector.load %arg6[%c0_38, %c0_39] : memref<2x16xf32, #tpu.memory_space<vmem>>, vector<2x16xf32>
      tpu.vector_store %arg6[%c0_38, %c0_39], %46 {strides = array<i32>} : memref<2x16xf32, #tpu.memory_space<vmem>>, vector<2x16xf32>,
      %cst_40 = arith.constant 0.000000e+00 : f32
      %48 = vector.broadcast %cst_40 : f32 to vector<2x1xf32>
      %c0_41 = arith.constant 0 : index
      %c0_42 = arith.constant 0 : index
      %49 = vector.load %arg7[%c0_41, %c0_42] : memref<2x1xf32, #tpu.memory_space<vmem>>, vector<2x1xf32>
      tpu.vector_store %arg7[%c0_41, %c0_42], %48 {strides = array<i32>} : memref<2x1xf32, #tpu.memory_space<vmem>>, vector<2x1xf32>,
    } else {
    }
    %c0 = arith.constant 0 : index
    %c0_1 = arith.constant 0 : index
    %3 = vector.load %arg1[%c0, %c0_1] : memref<32x2xf32, #tpu.memory_space<vmem>>, vector<32x2xf32>
    %c0_2 = arith.constant 0 : index
    %c0_3 = arith.constant 0 : index
    %4 = vector.load %arg2[%c0_2, %c0_3] : memref<32x16xf32, #tpu.memory_space<vmem>>, vector<32x16xf32>
    %5 = vector.extract_strided_slice %3 {offsets = [0, 0], sizes = [32, 1], strides = [1, 1]} : vector<32x2xf32> to vector<32x1xf32>
    %6 = vector.broadcast %5 : vector<32x1xf32> to vector<32x16xf32>
    %7 = arith.mulf %6, %4 : vector<32x16xf32>
    %c0_4 = arith.constant 0 : index
    %c0_5 = arith.constant 0 : index
    %8 = vector.load %arg5[%c0_4, %c0_5] : memref<2x16xf32, #tpu.memory_space<vmem>>, vector<1x16xf32>
    %cst = arith.constant dense<0xFF800000> : vector<16xf32>
    %9 = vector.multi_reduction <maximumf>, %7, %cst [0] : vector<32x16xf32> to vector<16xf32>
    %10 = vector.shape_cast %9 : vector<16xf32> to vector<1x16xf32>
    %11 = arith.maximumf %8, %10 : vector<1x16xf32>
    %c0_6 = arith.constant 0 : index
    %c0_7 = arith.constant 0 : index
    %12 = vector.load %arg5[%c0_6, %c0_7] : memref<2x16xf32, #tpu.memory_space<vmem>>, vector<1x16xf32>
    tpu.vector_store %arg5[%c0_6, %c0_7], %11 {strides = array<i32>} : memref<2x16xf32, #tpu.memory_space<vmem>>, vector<1x16xf32>,
    %c0_8 = arith.constant 0 : index
    %c0_9 = arith.constant 0 : index
    %13 = vector.load %arg6[%c0_8, %c0_9] : memref<2x16xf32, #tpu.memory_space<vmem>>, vector<1x16xf32>
    %cst_10 = arith.constant dense<0.000000e+00> : vector<16xf32>
    %14 = vector.multi_reduction <add>, %7, %cst_10 [0] : vector<32x16xf32> to vector<16xf32>
    %15 = vector.shape_cast %14 : vector<16xf32> to vector<1x16xf32>
    %16 = arith.addf %13, %15 : vector<1x16xf32>
    %c0_11 = arith.constant 0 : index
    %c0_12 = arith.constant 0 : index
    %17 = vector.load %arg6[%c0_11, %c0_12] : memref<2x16xf32, #tpu.memory_space<vmem>>, vector<1x16xf32>
    tpu.vector_store %arg6[%c0_11, %c0_12], %16 {strides = array<i32>} : memref<2x16xf32, #tpu.memory_space<vmem>>, vector<1x16xf32>,
    %c0_13 = arith.constant 0 : index
    %c0_14 = arith.constant 0 : index
    %18 = vector.load %arg7[%c0_13, %c0_14] : memref<2x1xf32, #tpu.memory_space<vmem>>, vector<1x1xf32>
    %cst_15 = arith.constant dense<0.000000e+00> : vector<1xf32>
    %19 = vector.multi_reduction <add>, %5, %cst_15 [0] : vector<32x1xf32> to vector<1xf32>
    %20 = vector.shape_cast %19 : vector<1xf32> to vector<1x1xf32>
    %21 = arith.addf %18, %20 : vector<1x1xf32>
    %c0_16 = arith.constant 0 : index
    %c0_17 = arith.constant 0 : index
    %22 = vector.load %arg7[%c0_16, %c0_17] : memref<2x1xf32, #tpu.memory_space<vmem>>, vector<1x1xf32>
    tpu.vector_store %arg7[%c0_16, %c0_17], %21 {strides = array<i32>} : memref<2x1xf32, #tpu.memory_space<vmem>>, vector<1x1xf32>,
    %23 = vector.extract_strided_slice %3 {offsets = [0, 1], sizes = [32, 1], strides = [1, 1]} : vector<32x2xf32> to vector<32x1xf32>
    %24 = vector.broadcast %23 : vector<32x1xf32> to vector<32x16xf32>
    %25 = arith.mulf %24, %4 : vector<32x16xf32>
    %c1 = arith.constant 1 : index
    %c0_18 = arith.constant 0 : index
    %26 = vector.load %arg5[%c1, %c0_18] : memref<2x16xf32, #tpu.memory_space<vmem>>, vector<1x16xf32>
    %cst_19 = arith.constant dense<0xFF800000> : vector<16xf32>
    %27 = vector.multi_reduction <maximumf>, %25, %cst_19 [0] : vector<32x16xf32> to vector<16xf32>
    %28 = vector.shape_cast %27 : vector<16xf32> to vector<1x16xf32>
    %29 = arith.maximumf %26, %28 : vector<1x16xf32>
    %c1_20 = arith.constant 1 : index
    %c0_21 = arith.constant 0 : index
    %30 = vector.load %arg5[%c1_20, %c0_21] : memref<2x16xf32, #tpu.memory_space<vmem>>, vector<1x16xf32>
    tpu.vector_store %arg5[%c1_20, %c0_21], %29 {strides = array<i32>} : memref<2x16xf32, #tpu.memory_space<vmem>>, vector<1x16xf32>,
    %c1_22 = arith.constant 1 : index
    %c0_23 = arith.constant 0 : index
    %31 = vector.load %arg6[%c1_22, %c0_23] : memref<2x16xf32, #tpu.memory_space<vmem>>, vector<1x16xf32>
    %cst_24 = arith.constant dense<0.000000e+00> : vector<16xf32>
    %32 = vector.multi_reduction <add>, %25, %cst_24 [0] : vector<32x16xf32> to vector<16xf32>
    %33 = vector.shape_cast %32 : vector<16xf32> to vector<1x16xf32>
    %34 = arith.addf %31, %33 : vector<1x16xf32>
    %c1_25 = arith.constant 1 : index
    %c0_26 = arith.constant 0 : index
    %35 = vector.load %arg6[%c1_25, %c0_26] : memref<2x16xf32, #tpu.memory_space<vmem>>, vector<1x16xf32>
    tpu.vector_store %arg6[%c1_25, %c0_26], %34 {strides = array<i32>} : memref<2x16xf32, #tpu.memory_space<vmem>>, vector<1x16xf32>,
    %c1_27 = arith.constant 1 : index
    %c0_28 = arith.constant 0 : index
    %36 = vector.load %arg7[%c1_27, %c0_28] : memref<2x1xf32, #tpu.memory_space<vmem>>, vector<1x1xf32>
    %cst_29 = arith.constant dense<0.000000e+00> : vector<1xf32>
    %37 = vector.multi_reduction <add>, %23, %cst_29 [0] : vector<32x1xf32> to vector<1xf32>
    %38 = vector.shape_cast %37 : vector<1xf32> to vector<1x1xf32>
    %39 = arith.addf %36, %38 : vector<1x1xf32>
    %c1_30 = arith.constant 1 : index
    %c0_31 = arith.constant 0 : index
    %40 = vector.load %arg7[%c1_30, %c0_31] : memref<2x1xf32, #tpu.memory_space<vmem>>, vector<1x1xf32>
    tpu.vector_store %arg7[%c1_30, %c0_31], %39 {strides = array<i32>} : memref<2x1xf32, #tpu.memory_space<vmem>>, vector<1x1xf32>,
    %c0_i32_32 = arith.constant 0 : i32
    %41 = arith.cmpi eq, %arg0, %c0_i32_32 : i32
    %42 = arith.extui %41 : i1 to i32
    %c0_i32_33 = arith.constant 0 : i32
    %43 = arith.cmpi ne, %42, %c0_i32_33 : i32
    scf.if %43 {
      %c0_34 = arith.constant 0 : index
      %c0_35 = arith.constant 0 : index
      %44 = vector.load %arg5[%c0_34, %c0_35] : memref<2x16xf32, #tpu.memory_space<vmem>>, vector<2x16xf32>
      %c0_36 = arith.constant 0 : index
      %c0_37 = arith.constant 0 : index
      %45 = vector.load %arg3[%c0_36, %c0_37] : memref<2x16xf32, #tpu.memory_space<vmem>>, vector<2x16xf32>
      tpu.vector_store %arg3[%c0_36, %c0_37], %44 {strides = array<i32>} : memref<2x16xf32, #tpu.memory_space<vmem>>, vector<2x16xf32>,
      %c0_38 = arith.constant 0 : index
      %c0_39 = arith.constant 0 : index
      %46 = vector.load %arg7[%c0_38, %c0_39] : memref<2x1xf32, #tpu.memory_space<vmem>>, vector<2x1xf32>
      %cst_40 = arith.constant 1.000000e+00 : f32
      %47 = vector.broadcast %cst_40 : f32 to vector<2x1xf32>
      %48 = arith.maximumf %46, %47 : vector<2x1xf32>
      %49 = tpu.reciprocal %48 {approx = true} : vector<2x1xf32> -> vector<2x1xf32>
      %c0_41 = arith.constant 0 : index
      %c0_42 = arith.constant 0 : index
      %50 = vector.load %arg6[%c0_41, %c0_42] : memref<2x16xf32, #tpu.memory_space<vmem>>, vector<2x16xf32>
      %51 = vector.broadcast %49 : vector<2x1xf32> to vector<2x16xf32>
      %52 = arith.mulf %50, %51 : vector<2x16xf32>
      %c0_43 = arith.constant 0 : index
      %c0_44 = arith.constant 0 : index
      %53 = vector.load %arg4[%c0_43, %c0_44] : memref<2x16xf32, #tpu.memory_space<vmem>>, vector<2x16xf32>
      tpu.vector_store %arg4[%c0_43, %c0_44], %52 {strides = array<i32>} : memref<2x16xf32, #tpu.memory_space<vmem>>, vector<2x16xf32>,
    } else {
    }
    return
  }
  func.func @transform_0(%arg0: i32) -> (i32, i32) {
    %c0_i32 = arith.constant 0 : i32
    %c0_i32_0 = arith.constant 0 : i32
    return %arg0, %c0_i32 : i32, i32
  }
  func.func @transform_1(%arg0: i32) -> (i32, i32) {
    %c0_i32 = arith.constant 0 : i32
    %c0_i32_0 = arith.constant 0 : i32
    return %arg0, %c0_i32 : i32, i32
  }
  func.func @transform_2(%arg0: i32) -> (i32, i32) {
    %c0_i32 = arith.constant 0 : i32
    %c0_i32_0 = arith.constant 0 : i32
    %c0_i32_1 = arith.constant 0 : i32
    return %c0_i32, %c0_i32_0 : i32, i32
  }
  func.func @transform_3(%arg0: i32) -> (i32, i32) {
    %c0_i32 = arith.constant 0 : i32
    %c0_i32_0 = arith.constant 0 : i32
    %c0_i32_1 = arith.constant 0 : i32
    return %c0_i32, %c0_i32_0 : i32, i32
  }
}

</mosaic_0001>

<bundles_post_ra>
// kernel: gcn_forward.5
= control target key start
LH: loop header
LB: loop body
LE: loop exit
PB: predicated region body
PF: predicated region fallthrough
CT: control target
= control target key end

     0   :  { %vm89_vm0 = vcmask 7168   ;;  %vm159_vm1 = vcmask 15368   ;;  %v213_v3 = vmov 0   ;;  %vm20_vm2 = vcmask 1024   ;;  %s301_s0 = inlined_call_operand.vmem [shape: f32[32,2], index: 0, kind: input, shape index: {}]   ;;  %s302_s1 = inlined_call_operand.vmem [shape: f32[32,16], index: 1, kind: input, shape index: {}]   ;;  %s303_s2 = inlined_call_operand.vmem [shape: f32[2,16], index: 2, kind: output, shape index: {0}]   ;;  %s304_s3 = inlined_call_operand.vmem [shape: f32[2,16], index: 3, kind: output, shape index: {1}]  }
   0x1   :  { %v22_v0 = vld [vmem:[%s301_s0] sm:$0xff]  ;;  %v23_v1 = vld [vmem:[%s301_s0 + $0x8] sm:$0xff]  ;;  %v24_v2 = vld [vmem:[%s301_s0 + $0x10] sm:$0xff]  ;;  %209 = vset.pattern.permute.xlu1 %v213_v3  ;;  %208 = vset.pattern.permute.xlu0 %v213_v3  ;;  %v214_v8 = vmov 0.0   ;;  %v215_v17 = vmov 1   ;;  %vm104_vm3 = vcmask 0  }
   0x2   :  { %v25_v4 = vld [vmem:[%s301_s0 + $0x18] sm:$0xff]  ;;  %v91_v5 = vsel %vm89_vm0, %v23_v1, 0.0  ;;  %v160_v6 = vsel %vm159_vm1, %v22_v0, 0.0  ;;  %v161_v7 = vsel %vm159_vm1, %v23_v1, 0.0  ;;  %37 = vperm.xlu1 %209, %v23_v1   ;;  %21 = vst.msk [vmem:[#allocation4] sm:$0x3] %vm20_vm2, %v214_v8 }
   0x3   :  { %v162_v9 = vadd.f32 %v161_v7, %v160_v6  ;;  %v163_v10 = vsel %vm159_vm1, %v24_v2, 0.0  ;;  %v93_v11 = vsel %vm89_vm0, %v24_v2, 0.0  ;;  %v165_v12 = vsel %vm159_vm1, %v25_v4, 0.0  ;;  %s216_s0 = smov 127   ;;  %v26_v36 = vld [vmem:[%s302_s1] sm:$0xff]  ;;  %v27_v42 = vld [vmem:[%s302_s1 + $0x8] sm:$0xff] }
   0x4   :  { %v90_v13 = vsel %vm89_vm0, %v22_v0, 0.0  ;;  %v95_v16 = vsel %vm89_vm0, %v25_v4, 0.0  ;;  %vm17_vm4 = vcmask 123904   ;;  %vm55_vm5 = vcmask 130048   ;;  %v28_v46 = vld [vmem:[%s302_s1 + $0x10] sm:$0xff]  ;;  %v29_v51 = vld [vmem:[%s302_s1 + $0x18] sm:$0xff] }
   0x5   :  { %v164_v14 = vadd.f32 %v163_v10, %v162_v9  ;;  %v92_v15 = vadd.f32 %v91_v5, %v90_v13  ;;  %18 = vst.msk [vmem:[#allocation2] sm:$0x3] %vm17_vm4, %v214_v8  ;;  %19 = vst.msk [vmem:[#allocation3] sm:$0x3] %vm17_vm4, %v214_v8  ;;  %vm70_vm6 = vcmask 122880  }
   0x6   :  { %210 = vset.pattern.permute.xlu1 %v215_v17 }
   0x7   :  { %v166_v18 = vadd.f32 %v165_v12, %v164_v14  ;;  %v94_v19 = vadd.f32 %v93_v11, %v92_v15  ;;  %107 = vperm.xlu1 %210, %v22_v0  }
   0x9   :  { %v167_v20 = vrot.slane %v166_v18, 4  ;;  %v96_v21 = vadd.f32 %v95_v16, %v94_v19  ;;  %v88_v32 = vld [vmem:[#allocation4] sm:$0x1]  ;;  %v158_v37 = vld [vmem:[#allocation4 + $0x1] sm:$0x1] }
   0xb   :  { %v168_v22 = vadd.f32 %v167_v20, %v166_v18  ;;  %v97_v23 = vrot.slane %v96_v21, 4  ;;  %111 = vperm.xlu1 %210, %v23_v1  }
   0xd   :  { %v169_v24 = vrot.slane %v168_v22, 2  ;;  %v98_v25 = vadd.f32 %v97_v23, %v96_v21 }
   0xf   :  { %v170_v26 = vadd.f32 %v169_v24, %v168_v22  ;;  %v99_v27 = vrot.slane %v98_v25, 2  ;;  %115 = vperm.xlu1 %210, %v24_v2  }
  0x11   :  { %v171_v28 = vrot.slane %v170_v26, 1  ;;  %v100_v29 = vadd.f32 %v99_v27, %v98_v25 }
  0x13   :  { %v172_v30 = vadd.f32 %v171_v28, %v170_v26  ;;  %119 = vperm.xlu1 %210, %v25_v4   ;;  %v101_v31 = vrot.slane %v100_v29, 1  ;;  %v142_v28 = vld [vmem:[#allocation3 + $0x1] sm:$0x1] }
  0x15   :  { %174 = vrot.lane.b32.xlu0 %v172_v30, %s216_s0  ;;  %v102_v33 = vadd.f32 %v101_v31, %v100_v29 }
  0x17   :  { %v103_v34 = vadd.f32 %v102_v33, %v88_v32 }
  0x19   :  { %32 = vperm.xlu0 %208, %v22_v0   ;;  %105 = vst.msk [vmem:[#allocation4] sm:$0x1] %vm104_vm3, %v103_v34  ;;  %v126_v34 = vld [vmem:[#allocation2 + $0x1] sm:$0x1] }
  0x1d   :  { %42 = vperm.xlu0 %208, %v24_v2  }
  0x21   :  { %47 = vperm.xlu0 %208, %v25_v4  }
  0x81   :  { %v38_v35 = vpop.permute.xlu1 %37 }
  0x82   :  { %v51_v62 = vmul.f32 %v38_v35, %v27_v42 }
  0x84   :  { %v74_v6 = vsel %vm55_vm5, %v51_v62, 0.0  ;;  %v57_v19 = vsel %vm55_vm5, %v51_v62, -inf }
  0x86   :  { %v108_v38 = vpop.permute.xlu1 %107 }
  0x87   :  { %v175_v39 = vpop.permute.xlu0 %174  ;;  %v122_v40 = vmul.f32 %v108_v38, %v26_v36 }
  0x88   :  { %v177_v41 = vadd.f32 %v175_v39, %v158_v37 }
  0x89   :  { %v143_v44 = vsel %vm55_vm5, %v122_v40, 0.0  ;;  %v127_v53 = vsel %vm55_vm5, %v122_v40, -inf }
  0x8a   :  { %178 = vst.msk [vmem:[#allocation4 + $0x1] sm:$0x1] %vm104_vm3, %v177_v41  ;;  %v112_v43 = vpop.permute.xlu1 %111 }
  0x8b   :  { %v123_v45 = vmul.f32 %v112_v43, %v27_v42 }
  0x8d   :  { %v144_v47 = vsel %vm55_vm5, %v123_v45, 0.0  ;;  %v128_v54 = vsel %vm55_vm5, %v123_v45, -inf }
  0x8e   :  { %v145_v48 = vadd.f32 %v144_v47, %v143_v44  ;;  %v116_v49 = vpop.permute.xlu1 %115  ;;  %v131_v61 = vmax.f32 %v127_v53, %v128_v54  ;;  %v54_v53 = vld [vmem:[#allocation2] sm:$0x1] }
  0x8f   :  { %v124_v50 = vmul.f32 %v116_v49, %v28_v46 }
  0x91   :  { %v185_v52 = vld [vmem:[#allocation4] sm:$0x3]  ;;  %v146_v55 = vsel %vm55_vm5, %v124_v50, 0.0  ;;  %v129_v59 = vsel %vm55_vm5, %v124_v50, -inf  ;;  %v72_v50 = vld [vmem:[#allocation3] sm:$0x1] }
  0x92   :  { %v186_v56 = vmax.f32 %v185_v52, 1.0  ;;  %v147_v57 = vadd.f32 %v146_v55, %v145_v48  ;;  %v120_v58 = vpop.permute.xlu1 %119 }
  0x93   :  { %v125_v60 = vmul.f32 %v120_v58, %v29_v51 }
  0x94   :  { %211 = vrcp.f32 %v186_v56 }
  0x95   :  { %v130_v63 = vsel %vm55_vm5, %v125_v60, -inf  ;;  %v148_v0 = vsel %vm55_vm5, %v125_v60, 0.0 }
  0x96   :  { %v132_v1 = vmax.f32 %v129_v59, %v130_v63  ;;  %v149_v2 = vadd.f32 %v148_v0, %v147_v57 }
  0x98   :  { %v33_v3 = vpop.permute.xlu0 %32  ;;  %v133_v4 = vmax.f32 %v131_v61, %v132_v1  ;;  %v150_v5 = vrot.slane %v149_v2, 4 }
  0x99   :  { %v50_v7 = vmul.f32 %v33_v3, %v26_v36 }
  0x9a   :  { %v134_v8 = vrot.slane %v133_v4, 4  ;;  %v151_v9 = vadd.f32 %v150_v5, %v149_v2 }
  0x9b   :  { %v73_v10 = vsel %vm55_vm5, %v50_v7, 0.0  ;;  %v56_v20 = vsel %vm55_vm5, %v50_v7, -inf }
  0x9c   :  { %v75_v11 = vadd.f32 %v74_v6, %v73_v10  ;;  %v43_v12 = vpop.permute.xlu0 %42  ;;  %v135_v13 = vmax.f32 %v133_v4, %v134_v8  ;;  %v152_v14 = vrot.slane %v151_v9, 2  ;;  %v60_v29 = vmax.f32 %v56_v20, %v57_v19 }
  0x9d   :  { %v52_v15 = vmul.f32 %v43_v12, %v28_v46 }
  0x9e   :  { %v212_v16 = vpop.eup %211  ;;  %v136_v17 = vrot.slane %v135_v13, 2  ;;  %v153_v18 = vadd.f32 %v152_v14, %v151_v9 }
  0x9f   :  { %191 = vperm.xlu0 %208, %v212_v16   ;;  %v76_v21 = vsel %vm55_vm5, %v52_v15, 0.0  ;;  %v58_v26 = vsel %vm55_vm5, %v52_v15, -inf }
  0xa0   :  { %v77_v22 = vadd.f32 %v76_v21, %v75_v11  ;;  %v137_v23 = vmax.f32 %v135_v13, %v136_v17  ;;  %v154_v24 = vrot.slane %v153_v18, 1  ;;  %v48_v25 = vpop.permute.xlu0 %47 }
  0xa1   :  { %v53_v27 = vmul.f32 %v48_v25, %v29_v51 }
  0xa2   :  { %v138_v30 = vrot.slane %v137_v23, 1  ;;  %v155_v31 = vadd.f32 %v154_v24, %v153_v18 }
  0xa3   :  { %v59_v32 = vsel %vm55_vm5, %v53_v27, -inf  ;;  %v78_v33 = vsel %vm55_vm5, %v53_v27, 0.0 }
  0xa4   :  { %v139_v35 = vmax.f32 %v137_v23, %v138_v30  ;;  %v61_v36 = vmax.f32 %v58_v26, %v59_v32  ;;  %v79_v37 = vadd.f32 %v78_v33, %v77_v22  ;;  %v156_v38 = vadd.f32 %v155_v31, %v142_v28 }
  0xa6   :  { %v62_v39 = vmax.f32 %v60_v29, %v61_v36  ;;  %v80_v40 = vrot.slane %v79_v37, 4  ;;  %v140_v41 = vmax.f32 %v126_v34, %v139_v35  ;;  %157 = vst.msk [vmem:[#allocation3 + $0x1] sm:$0x1] %vm70_vm6, %v156_v38 }
  0xa8   :  { %v63_v42 = vrot.slane %v62_v39, 4  ;;  %v81_v43 = vadd.f32 %v80_v40, %v79_v37  ;;  %141 = vst.msk [vmem:[#allocation2 + $0x1] sm:$0x1] %vm70_vm6, %v140_v41 }
  0xaa   :  { %v64_v44 = vmax.f32 %v62_v39, %v63_v42  ;;  %v82_v45 = vrot.slane %v81_v43, 2 }
  0xac   :  { %v65_v46 = vrot.slane %v64_v44, 2  ;;  %v83_v47 = vadd.f32 %v82_v45, %v81_v43 }
  0xae   :  { %v66_v48 = vmax.f32 %v64_v44, %v65_v46  ;;  %v84_v49 = vrot.slane %v83_v47, 1 }
  0xb0   :  { %v67_v51 = vrot.slane %v66_v48, 1  ;;  %v85_v52 = vadd.f32 %v84_v49, %v83_v47 }
  0xb2   :  { %v68_v54 = vmax.f32 %v66_v48, %v67_v51  ;;  %v86_v55 = vadd.f32 %v85_v52, %v72_v50 }
  0xb4   :  { %v69_v56 = vmax.f32 %v54_v53, %v68_v54  ;;  %87 = vst.msk [vmem:[#allocation3] sm:$0x1] %vm70_vm6, %v86_v55 }
  0xb6   :  { %71 = vst.msk [vmem:[#allocation2] sm:$0x1] %vm70_vm6, %v69_v56 }
  0xbb   :  { %v188_v58 = vld [vmem:[#allocation3] sm:$0x3] }
  0xbd   :  { %v182_v57 = vld [vmem:[#allocation2] sm:$0x3] }
  0xbe   :  { %184 = vst.msk [vmem:[%s303_s2] sm:$0x3] %vm17_vm4, %v182_v57 }
 0x11e   :  { %v192_v59 = vpop.permute.xlu0 %191 }
 0x11f   :  { %v194_v60 = vmul.f32 %v192_v59, %v188_v58 }
 0x121   :  { %195 = vst.msk [vmem:[%s304_s3] sm:$0x3] %vm17_vm4, %v194_v60 }

// kernel: gcn_forward.3
= control target key start
LH: loop header
LB: loop body
LE: loop exit
PB: predicated region body
PF: predicated region fallthrough
CT: control target
= control target key end

     0   :  { %vm22_vm0 = vcmask 64512   ;;  %v275_v1 = vmov 0.0   ;;  %vm61_vm1 = vcmask 261120   ;;  %vm149_vm2 = vcmask 1043456   ;;  %s341_s1 = inlined_call_operand.vmem [shape: bf16[32,8], index: 1, kind: input, shape index: {}]   ;;  %s342_s0 = inlined_call_operand.vmem [shape: bf16[32,32], index: 0, kind: input, shape index: {}]   ;;  %s343_s2 = inlined_call_operand.vmem [shape: bf16[8,16], index: 2, kind: input, shape index: {}]   ;;  %s344_s3 = inlined_call_operand.vmem [shape: f32[1,16], index: 3, kind: input, shape index: {}]   ;;  %s345_s4 = inlined_call_operand.vmem [shape: bf16[32,16], index: 4, kind: output, shape index: {}]  }
   0x1   :  { %v271_v0 = vld [vmem:[%s341_s1] sm:$0xff]   ;;  %25 = vst.msk [vmem:[#allocation2 + $0x10] sm:$0xff] %vm22_vm0, %v275_v1  ;;  %23 = vst.msk [vmem:[#allocation2] sm:$0xff] %vm22_vm0, %v275_v1  ;;  %v272_v2 = vld [vmem:[%s341_s1 + $0x8] sm:$0xff]   ;;  %vm222_vm3 = vcmask 125952  }
   0x2   :  { %24 = vst.msk [vmem:[#allocation2 + $0x8] sm:$0xff] %vm22_vm0, %v275_v1  ;;  %26 = vst.msk [vmem:[#allocation2 + $0x18] sm:$0xff] %vm22_vm0, %v275_v1  ;;  %255 = vmatprep.subr.bf16.mxu0 %v271_v0  ;;  %v273_v3 = vld [vmem:[%s342_s0] sm:$0xff]   ;;  %v274_v4 = vld [vmem:[%s342_s0 + $0x8] sm:$0xff]  }
   0x3   :  { %256 = vmatpush3.bf16.msra.mxu0 %v271_v0  ;;  %259 = vmatprep.mubr.msk.bf16.mxu0 %vm61_vm1, %v273_v3  ;;  %v135_v5 = vld [vmem:[%s343_s2] sm:$0xf] }
   0x4   :  { %257 = vmatprep.subr.bf16.mxu0 %v272_v2  ;;  %269 = vmatprep.subr.msk.bf16.mxu1 %vm149_vm2, %v135_v5  ;;  %v151_v6 = vsel %vm149_vm2, %v135_v5, 0  ;;  %v237_v25 = vld [vmem:[%s344_s3] ss:$0 sm:$0xff] }
   0x5   :  { %264 = vmatpush3.bf16.msra.mxu1 %v151_v6 }
   0x7   :  { %258 = vmatpush3.bf16.msra.mxu0 %v272_v2 }
   0x8   :  { %v29_v7 = vld [vmem:[#allocation2 + $0x10] sm:$0xff]  ;;  %v27_v8 = vld [vmem:[#allocation2] sm:$0xff] }
   0x9   :  { %v30_v10 = vld [vmem:[#allocation2 + $0x18] sm:$0xff]  ;;  %v28_v13 = vld [vmem:[#allocation2 + $0x8] sm:$0xff] }
   0xa   :  { %260 = vmatmul.mubr.msk.bf16.vlgmr.msra.gmra.mrb[0].mxu0 %vm61_vm1, %v274_v4 }
  0xdd   :  { %v261_v9 = vpop.f32.mrb[0].mxu0 }
  0xde   :  { %v119_v11 = vadd.f32 %v261_v9, %v29_v7  ;;  %v102_v12 = vpop.f32.mrb[1].mxu0 }
  0xdf   :  { %v117_v14 = vadd.f32 %v102_v12, %v27_v8  ;;  %v262_v15 = vpop.f32.mrb[2].mxu0 }
  0xe0   :  { %124 = vst.msk [vmem:[#allocation2 + $0x10] sm:$0xff] %vm22_vm0, %v119_v11  ;;  %v120_v16 = vadd.f32 %v262_v15, %v30_v10  ;;  %v105_v17 = vpop.f32.mrb[3].mxu0 }
  0xe1   :  { %122 = vst.msk [vmem:[#allocation2] sm:$0xff] %vm22_vm0, %v117_v14  ;;  %v118_v18 = vadd.f32 %v105_v17, %v28_v13 }
  0xe2   :  { %125 = vst.msk [vmem:[#allocation2 + $0x18] sm:$0xff] %vm22_vm0, %v120_v16 }
  0xe3   :  { %123 = vst.msk [vmem:[#allocation2 + $0x8] sm:$0xff] %vm22_vm0, %v118_v18 }
  0xe7   :  { %v131_v23 = vld [vmem:[#allocation2 + $0x10] sm:$0xff] }
  0xe8   :  { %v129_v20 = vld [vmem:[#allocation2] sm:$0xff] }
  0xe9   :  { %v132_v19 = vld [vmem:[#allocation2 + $0x18] sm:$0xff] }
  0xea   :  { %v130_v21 = vld [vmem:[#allocation2 + $0x8] sm:$0xff]  ;;  %v134_v24 = vpack.c.bf16 %v132_v19, %v131_v23 }
  0xeb   :  { %v133_v22 = vpack.c.bf16 %v130_v21, %v129_v20 }
  0xed   :  { %265 = vmatprep.mubr.msk.bf16.mxu1 %vm22_vm0, %v133_v22 }
  0xee   :  { %266 = vmatmul.mubr.msk.bf16.vlgmr.msra.gmra.mrb[0].mxu1 %vm22_vm0, %v134_v24 }
 0x1c1   :  { %v267_v26 = vpop.f32.mrb[0].mxu1 }
 0x1c2   :  { %v196_v27 = vadd.f32 %v267_v26, %v237_v25  ;;  %v187_v28 = vpop.f32.mrb[1].mxu1 }
 0x1c3   :  { %v188_v29 = vadd.f32 %v237_v25, %v187_v28  ;;  %v268_v30 = vpop.f32.mrb[2].mxu1 }
 0x1c4   :  { %v204_v31 = vmax.f32 %v196_v27, 0.0  ;;  %v199_v32 = vadd.f32 %v268_v30, %v237_v25  ;;  %v190_v33 = vpop.f32.mrb[3].mxu1 }
 0x1c5   :  { %v202_v34 = vmax.f32 %v188_v29, 0.0  ;;  %v191_v35 = vadd.f32 %v237_v25, %v190_v33 }
 0x1c6   :  { %v246_v36 = vpack.c.bf16 %v204_v31, %v204_v31  ;;  %v205_v37 = vmax.f32 %v199_v32, 0.0 }
 0x1c7   :  { %v244_v38 = vpack.c.bf16 %v202_v34, %v202_v34  ;;  %v203_v39 = vmax.f32 %v191_v35, 0.0 }
 0x1c8   :  { %225 = vst.msk [vmem:[%s345_s4 + $0x8] sm:$0xf] %vm222_vm3, %v246_v36  ;;  %v247_v40 = vpack.c.bf16 %v205_v37, %v205_v37 }
 0x1c9   :  { %223 = vst.msk [vmem:[%s345_s4] sm:$0xf] %vm222_vm3, %v244_v38  ;;  %v245_v41 = vpack.c.bf16 %v203_v39, %v203_v39 }
 0x1ca   :  { %226 = vst.msk [vmem:[%s345_s4 + $0xc] sm:$0xf] %vm222_vm3, %v247_v40 }
 0x1cb   :  { %224 = vst.msk [vmem:[%s345_s4 + $0x4] sm:$0xf] %vm222_vm3, %v245_v41 }

// kernel: gcn_forward.4
= control target key start
LH: loop header
LB: loop body
LE: loop exit
PB: predicated region body
PF: predicated region fallthrough
CT: control target
= control target key end

     0   :  { %vm22_vm0 = vcmask 130048   ;;  %v254_v1 = vmov 0.0   ;;  %vm61_vm1 = vcmask 261120   ;;  %s324_s1 = inlined_call_operand.vmem [shape: bf16[32,16], index: 1, kind: input, shape index: {}]   ;;  %s325_s0 = inlined_call_operand.vmem [shape: bf16[32,32], index: 0, kind: input, shape index: {}]   ;;  %s326_s2 = inlined_call_operand.vmem [shape: bf16[16,16], index: 2, kind: input, shape index: {}]   ;;  %s327_s3 = inlined_call_operand.vmem [shape: f32[1,16], index: 3, kind: input, shape index: {}]   ;;  %s328_s4 = inlined_call_operand.vmem [shape: f32[32,16], index: 4, kind: output, shape index: {}]  }
   0x1   :  { %v249_v0 = vld [vmem:[%s324_s1] sm:$0xff]   ;;  %25 = vst.msk [vmem:[#allocation2 + $0x10] sm:$0xff] %vm22_vm0, %v254_v1  ;;  %23 = vst.msk [vmem:[#allocation2] sm:$0xff] %vm22_vm0, %v254_v1  ;;  %v250_v2 = vld [vmem:[%s324_s1 + $0x8] sm:$0xff]  }
   0x2   :  { %24 = vst.msk [vmem:[#allocation2 + $0x8] sm:$0xff] %vm22_vm0, %v254_v1  ;;  %26 = vst.msk [vmem:[#allocation2 + $0x18] sm:$0xff] %vm22_vm0, %v254_v1  ;;  %234 = vmatprep.subr.bf16.mxu0 %v249_v0  ;;  %v251_v3 = vld [vmem:[%s325_s0] sm:$0xff]   ;;  %v252_v4 = vld [vmem:[%s325_s0 + $0x8] sm:$0xff]  }
   0x3   :  { %235 = vmatpush3.bf16.msra.mxu0 %v249_v0  ;;  %238 = vmatprep.mubr.msk.bf16.mxu0 %vm61_vm1, %v251_v3  ;;  %v253_v5 = vld [vmem:[%s326_s2] sm:$0xff]  }
   0x4   :  { %236 = vmatprep.subr.bf16.mxu0 %v250_v2  ;;  %242 = vmatprep.subr.bf16.mxu1 %v253_v5  ;;  %v223_v24 = vld [vmem:[%s327_s3] ss:$0 sm:$0xff] }
   0x5   :  { %243 = vmatpush3.bf16.msra.mxu1 %v253_v5 }
   0x7   :  { %237 = vmatpush3.bf16.msra.mxu0 %v250_v2 }
   0x8   :  { %v29_v6 = vld [vmem:[#allocation2 + $0x10] sm:$0xff]  ;;  %v27_v7 = vld [vmem:[#allocation2] sm:$0xff] }
   0x9   :  { %v30_v9 = vld [vmem:[#allocation2 + $0x18] sm:$0xff]  ;;  %v28_v12 = vld [vmem:[#allocation2 + $0x8] sm:$0xff] }
   0xa   :  { %239 = vmatmul.mubr.msk.bf16.vlgmr.msra.gmra.mrb[0].mxu0 %vm61_vm1, %v252_v4 }
  0xdd   :  { %v240_v8 = vpop.f32.mrb[0].mxu0 }
  0xde   :  { %v119_v10 = vadd.f32 %v240_v8, %v29_v6  ;;  %v102_v11 = vpop.f32.mrb[1].mxu0 }
  0xdf   :  { %v117_v13 = vadd.f32 %v102_v11, %v27_v7  ;;  %v241_v14 = vpop.f32.mrb[2].mxu0 }
  0xe0   :  { %124 = vst.msk [vmem:[#allocation2 + $0x10] sm:$0xff] %vm22_vm0, %v119_v10  ;;  %v120_v15 = vadd.f32 %v241_v14, %v30_v9  ;;  %v105_v16 = vpop.f32.mrb[3].mxu0 }
  0xe1   :  { %122 = vst.msk [vmem:[#allocation2] sm:$0xff] %vm22_vm0, %v117_v13  ;;  %v118_v17 = vadd.f32 %v105_v16, %v28_v12 }
  0xe2   :  { %125 = vst.msk [vmem:[#allocation2 + $0x18] sm:$0xff] %vm22_vm0, %v120_v15 }
  0xe3   :  { %123 = vst.msk [vmem:[#allocation2 + $0x8] sm:$0xff] %vm22_vm0, %v118_v17 }
  0xe7   :  { %v131_v22 = vld [vmem:[#allocation2 + $0x10] sm:$0xff] }
  0xe8   :  { %v129_v19 = vld [vmem:[#allocation2] sm:$0xff] }
  0xe9   :  { %v132_v18 = vld [vmem:[#allocation2 + $0x18] sm:$0xff] }
  0xea   :  { %v130_v20 = vld [vmem:[#allocation2 + $0x8] sm:$0xff]  ;;  %v134_v23 = vpack.c.bf16 %v132_v18, %v131_v22 }
  0xeb   :  { %v133_v21 = vpack.c.bf16 %v130_v20, %v129_v19 }
  0xed   :  { %244 = vmatprep.mubr.msk.bf16.mxu1 %vm22_vm0, %v133_v21 }
  0xee   :  { %245 = vmatmul.mubr.msk.bf16.vlgmr.msra.gmra.mrb[0].mxu1 %vm22_vm0, %v134_v23 }
 0x1c1   :  { %v246_v25 = vpop.f32.mrb[0].mxu1 }
 0x1c2   :  { %v199_v26 = vadd.f32 %v246_v25, %v223_v24  ;;  %v190_v27 = vpop.f32.mrb[1].mxu1 }
 0x1c3   :  { %v191_v28 = vadd.f32 %v223_v24, %v190_v27  ;;  %v247_v29 = vpop.f32.mrb[2].mxu1 }
 0x1c4   :  { %v207_v30 = vmax.f32 %v199_v26, 0.0  ;;  %v202_v31 = vadd.f32 %v247_v29, %v223_v24  ;;  %v193_v32 = vpop.f32.mrb[3].mxu1 }
 0x1c5   :  { %v205_v33 = vmax.f32 %v191_v28, 0.0  ;;  %v194_v34 = vadd.f32 %v223_v24, %v193_v32 }
 0x1c6   :  { %211 = vst.msk [vmem:[%s328_s4 + $0x10] sm:$0xff] %vm22_vm0, %v207_v30  ;;  %v208_v35 = vmax.f32 %v202_v31, 0.0 }
 0x1c7   :  { %209 = vst.msk [vmem:[%s328_s4] sm:$0xff] %vm22_vm0, %v205_v33  ;;  %v206_v36 = vmax.f32 %v194_v34, 0.0 }
 0x1c8   :  { %212 = vst.msk [vmem:[%s328_s4 + $0x18] sm:$0xff] %vm22_vm0, %v208_v35 }
 0x1c9   :  { %210 = vst.msk [vmem:[%s328_s4 + $0x8] sm:$0xff] %vm22_vm0, %v206_v36 }

</bundles_post_ra>
